<compile_context>
chip_gen: v7x
topology: tpu7x:2x2x1
jax: 0.10.0
libtpu: 0.0.40
codegen_flags: <defaults>
</compile_context>

<pallas_src>
import functools

import jax
import jax.numpy as jnp
import numpy as np
from jax.experimental import pallas as pl
from jax.experimental.pallas import tpu as pltpu


def _complex_vector_kernel(w_ref, sr_ref, si_ref, or_ref, oi_ref, out_ref):
    # Blocks: w (D, 2); slabs (D, TB); out (1, TB).  Batch on lanes.
    w0 = w_ref[:, 0:1]                        # (D, 1) -> broadcasts over lanes
    w1 = w_ref[:, 1:2]
    sr = sr_ref[...].astype(jnp.float32)      # (D, TB)
    si = si_ref[...].astype(jnp.float32)
    o_r = or_ref[...].astype(jnp.float32)
    o_i = oi_ref[...].astype(jnp.float32)
    # Factored ComplEx score: w0*(sr*or + si*oi) + w1*(sr*oi - si*or)
    prod = w0 * (sr * o_r + si * o_i) + w1 * (sr * o_i - si * o_r)
    # Sublane (XLU) reduction over D -> lane-dense (1, TB) output row.
    out_ref[...] = jnp.sum(prod, axis=0, keepdims=True)


def _round_up(x, m):
    return ((x + m - 1) // m) * m


def _choose_tile_b(B, D, itemsize, desired):
    # Keep the 4 double-buffered (D, tile_b) input slabs under ~16 MiB so we
    # have headroom inside v7x's 32 MiB scoped-VMEM default (64 MiB physical);
    # v5e/v6e (128 MiB) trivially satisfy the same bound.
    budget = 16 * 1024 * 1024
    cap = max(128, budget // (4 * 2 * D * itemsize))
    tile = max(128, (min(desired, cap) // 128) * 128)
    return min(tile, _round_up(B, 128))


@functools.partial(jax.jit, static_argnames=("tile_b",))
def _complex_vector_score(w_t, s_r, s_i, o_r, o_i, *, tile_b):
    D, Bp = s_r.shape
    grid = (Bp // tile_b,)
    slab_spec = pl.BlockSpec((D, tile_b), lambda i: (0, i))
    w_spec = pl.BlockSpec((D, 2), lambda i: (0, 0))
    out_spec = pl.BlockSpec((1, tile_b), lambda i: (0, i))

    return pl.pallas_call(
        _complex_vector_kernel,
        out_shape=jax.ShapeDtypeStruct((1, Bp), jnp.float32),
        grid_spec=pltpu.PrefetchScalarGridSpec(
            num_scalar_prefetch=0,
            grid=grid,
            in_specs=[w_spec, slab_spec, slab_spec, slab_spec, slab_spec],
            out_specs=out_spec,
        ),
        compiler_params=pltpu.CompilerParams(
            dimension_semantics=("parallel",)),
    )(w_t, s_r, s_i, o_r, o_i)


@functools.partial(jax.jit, static_argnames=("tile_b", "input_dtype"))
def _forward_flat(idxs_flat, emb_re, emb_im, w, *, tile_b, input_dtype):
    B = idxs_flat.shape[0]
    D = emb_re.shape[-1]
    itemsize = jnp.dtype(input_dtype).itemsize
    tb = _choose_tile_b(B, D, itemsize, tile_b)
    Bp = _round_up(B, tb)

    # Pad only the tiny (B, 2) int32 index array; padded rows gather entity 0
    # and are sliced off at the end.  (No HBM-sized pad/copy of the slabs.)
    if Bp != B:
        idxs_flat = jnp.pad(idxs_flat, ((0, Bp - B), (0, 0)))

    s_idx = idxs_flat[:, 0]
    o_idx = idxs_flat[:, 1]

    # Gather + transpose to (D, Bp) slabs (batch on lanes).  XLA fuses the
    # gather with the layout change.
    def slab(tbl, idx):
        return jnp.take(tbl, idx, axis=0).T.astype(input_dtype)

    s_r = slab(emb_re, s_idx)
    s_i = slab(emb_im, s_idx)
    o_r = slab(emb_re, o_idx)
    o_i = slab(emb_im, o_idx)
    w_t = w.T.astype(jnp.float32)              # (D, 2)

    logits = _complex_vector_score(w_t, s_r, s_i, o_r, o_i, tile_b=tb)
    return logits[0, :B]


def complex_vector_forward(idxs, emb_re, emb_im, w, *, tile_b=1024,
                           input_dtype=jnp.float32):
    """Forward pass matching ComplexVector.forward.

    idxs: int array (..., 2) of entity indices (subject, object).
    emb_re, emb_im: (num_entity, dim) float32 embedding tables.
    w: (2, dim) float32 parameter.
    input_dtype: dtype used for the slabs fed to the kernel (f32 default,
        bf16 halves HBM traffic; accumulation is always f32).
    Returns float32 logits of shape idxs.shape[:-1].
    """
    batch_shape = idxs.shape[:-1]
    idxs_flat = idxs.reshape(-1, 2)
    logits = _forward_flat(idxs_flat, emb_re, emb_im, w,
                           tile_b=tile_b, input_dtype=input_dtype)
    return logits.reshape(batch_shape)


def _reference_forward(idxs, emb_re, emb_im, w):
    ents_re = jnp.take(emb_re, idxs, axis=0)
    ents_im = jnp.take(emb_im, idxs, axis=0)
    s_r, o_r = ents_re[..., 0, :], ents_re[..., 1, :]
    s_i, o_i = ents_im[..., 0, :], ents_im[..., 1, :]
    return ((s_r * w[0] * o_r).sum(-1) + (s_i * w[0] * o_i).sum(-1)
            + (s_r * w[1] * o_i).sum(-1) - (s_i * w[1] * o_r).sum(-1))


if __name__ == "__main__":
    num_entity, dim = 20, 32
    batch = 10   # deliberately not a multiple of the 128-lane tile

    key = jax.random.PRNGKey(0)
    k_re, k_im, k_w, k_idx, k_idx2 = jax.random.split(key, 5)

    # Synthetic parameters matching the torch module's shapes.
    emb_re = jax.random.normal(k_re, (num_entity, dim), dtype=jnp.float32)
    emb_im = jax.random.normal(k_im, (num_entity, dim), dtype=jnp.float32)
    w = jax.random.normal(k_w, (2, dim), dtype=jnp.float32)

    # 1) flat (batch, 2) indices, f32 inputs.
    idxs = jax.random.randint(k_idx, (batch, 2), 0, num_entity, dtype=jnp.int32)
    logits = jax.block_until_ready(complex_vector_forward(idxs, emb_re, emb_im, w))
    ref = _reference_forward(idxs, emb_re, emb_im, w)
    np.testing.assert_allclose(np.asarray(logits), np.asarray(ref),
                               rtol=1e-5, atol=1e-5)
    assert logits.shape == idxs.shape[:-1]

    # 2) multi-dim batch shape (3, 5, 2).
    idxs2 = jax.random.randint(k_idx2, (3, 5, 2), 0, num_entity, dtype=jnp.int32)
    logits2 = jax.block_until_ready(complex_vector_forward(idxs2, emb_re, emb_im, w))
    ref2 = _reference_forward(idxs2, emb_re, emb_im, w)
    np.testing.assert_allclose(np.asarray(logits2), np.asarray(ref2),
                               rtol=1e-5, atol=1e-5)
    assert logits2.shape == idxs2.shape[:-1]

    # 3) optional bf16-input path (halved HBM traffic; f32 accumulation).
    logits_bf16 = jax.block_until_ready(
        complex_vector_forward(idxs, emb_re, emb_im, w,
                               input_dtype=jnp.bfloat16))
    np.testing.assert_allclose(np.asarray(logits_bf16), np.asarray(ref),
                               rtol=5e-2, atol=1.0)

    print("KERNEL_OK")
</pallas_src>

<mosaic_0001>
module attributes {stable_mosaic.version = 11 : i64} {
  func.func @_complex_vector_kernel(%arg0: i32, %arg1: memref<32x2xf32, #tpu.memory_space<vmem>>, %arg2: memref<32x128xf32, #tpu.memory_space<vmem>>, %arg3: memref<32x128xf32, #tpu.memory_space<vmem>>, %arg4: memref<32x128xf32, #tpu.memory_space<vmem>>, %arg5: memref<32x128xf32, #tpu.memory_space<vmem>>, %arg6: memref<1x128xf32, #tpu.memory_space<vmem>>) attributes {dimension_semantics = [#tpu.dimension_semantics<parallel>], iteration_bounds = array<i64: 1>, scalar_prefetch = 0 : i64, scratch_operands = 0 : i64, tpu.core_type = #tpu.core_type<tc>, window_params = [{pipeline_mode = #tpu.pipeline_mode<synchronous>, transform_indices = @transform_0, window_bounds = array<i64: 32, 2>}, {transform_indices = @transform_1, window_bounds = array<i64: 32, 128>}, {transform_indices = @transform_2, window_bounds = array<i64: 32, 128>}, {transform_indices = @transform_3, window_bounds = array<i64: 32, 128>}, {transform_indices = @transform_4, window_bounds = array<i64: 32, 128>}, {transform_indices = @transform_5, window_bounds = array<i64: 1, 128>}]} {
    %c0 = arith.constant 0 : index
    %c0_0 = arith.constant 0 : index
    %0 = vector.load %arg1[%c0, %c0_0] : memref<32x2xf32, #tpu.memory_space<vmem>>, vector<32x1xf32>
    %c0_1 = arith.constant 0 : index
    %c1 = arith.constant 1 : index
    %1 = vector.load %arg1[%c0_1, %c1] : memref<32x2xf32, #tpu.memory_space<vmem>>, vector<32x1xf32>
    %c0_2 = arith.constant 0 : index
    %c0_3 = arith.constant 0 : index
    %2 = vector.load %arg2[%c0_2, %c0_3] : memref<32x128xf32, #tpu.memory_space<vmem>>, vector<32x128xf32>
    %c0_4 = arith.constant 0 : index
    %c0_5 = arith.constant 0 : index
    %3 = vector.load %arg3[%c0_4, %c0_5] : memref<32x128xf32, #tpu.memory_space<vmem>>, vector<32x128xf32>
    %c0_6 = arith.constant 0 : index
    %c0_7 = arith.constant 0 : index
    %4 = vector.load %arg4[%c0_6, %c0_7] : memref<32x128xf32, #tpu.memory_space<vmem>>, vector<32x128xf32>
    %c0_8 = arith.constant 0 : index
    %c0_9 = arith.constant 0 : index
    %5 = vector.load %arg5[%c0_8, %c0_9] : memref<32x128xf32, #tpu.memory_space<vmem>>, vector<32x128xf32>
    %6 = arith.mulf %2, %4 : vector<32x128xf32>
    %7 = arith.mulf %3, %5 : vector<32x128xf32>
    %8 = arith.addf %6, %7 : vector<32x128xf32>
    %9 = vector.broadcast %0 : vector<32x1xf32> to vector<32x128xf32>
    %10 = arith.mulf %9, %8 : vector<32x128xf32>
    %11 = arith.mulf %2, %5 : vector<32x128xf32>
    %12 = arith.mulf %3, %4 : vector<32x128xf32>
    %13 = arith.subf %11, %12 : vector<32x128xf32>
    %14 = vector.broadcast %1 : vector<32x1xf32> to vector<32x128xf32>
    %15 = arith.mulf %14, %13 : vector<32x128xf32>
    %16 = arith.addf %10, %15 : vector<32x128xf32>
    %cst = arith.constant dense<0.000000e+00> : vector<128xf32>
    %17 = vector.multi_reduction <add>, %16, %cst [0] : vector<32x128xf32> to vector<128xf32>
    %18 = vector.shape_cast %17 : vector<128xf32> to vector<1x128xf32>
    %c0_10 = arith.constant 0 : index
    %c0_11 = arith.constant 0 : index
    %19 = vector.load %arg6[%c0_10, %c0_11] : memref<1x128xf32, #tpu.memory_space<vmem>>, vector<1x128xf32>
    tpu.vector_store %arg6[%c0_10, %c0_11], %18 {strides = array<i32>} : memref<1x128xf32, #tpu.memory_space<vmem>>, vector<1x128xf32>,
    return
  }
  func.func @transform_0(%arg0: i32) -> (i32, i32) {
    %c0_i32 = arith.constant 0 : i32
    %c0_i32_0 = arith.constant 0 : i32
    %c0_i32_1 = arith.constant 0 : i32
    return %c0_i32, %c0_i32_0 : i32, i32
  }
  func.func @transform_1(%arg0: i32) -> (i32, i32) {
    %c0_i32 = arith.constant 0 : i32
    %c0_i32_0 = arith.constant 0 : i32
    return %c0_i32, %arg0 : i32, i32
  }
  func.func @transform_2(%arg0: i32) -> (i32, i32) {
    %c0_i32 = arith.constant 0 : i32
    %c0_i32_0 = arith.constant 0 : i32
    return %c0_i32, %arg0 : i32, i32
  }
  func.func @transform_3(%arg0: i32) -> (i32, i32) {
    %c0_i32 = arith.constant 0 : i32
    %c0_i32_0 = arith.constant 0 : i32
    return %c0_i32, %arg0 : i32, i32
  }
  func.func @transform_4(%arg0: i32) -> (i32, i32) {
    %c0_i32 = arith.constant 0 : i32
    %c0_i32_0 = arith.constant 0 : i32
    return %c0_i32, %arg0 : i32, i32
  }
  func.func @transform_5(%arg0: i32) -> (i32, i32) {
    %c0_i32 = arith.constant 0 : i32
    %c0_i32_0 = arith.constant 0 : i32
    return %c0_i32, %arg0 : i32, i32
  }
}

</mosaic_0001>

<bundles_post_ra>
// kernel: _complex_vector_score.1
= control target key start
LH: loop header
LB: loop body
LE: loop exit
PB: predicated region body
PF: predicated region fallthrough
CT: control target
= control target key end

     0   :  { %10 = vsyncpa [#allocation3], 0  ;;  %s411_s0 = inlined_call_operand.vmem [shape: f32[32,2], index: 0, kind: input, shape index: {}]   ;;  %s412_s1 = inlined_call_operand.vmem [shape: f32[32,128], index: 1, kind: input, shape index: {}]   ;;  %s413_s2 = inlined_call_operand.hbm [shape: f32[32,128], index: 2, kind: input, shape index: {}]   ;;  %s414_s3 = inlined_call_operand.hbm [shape: f32[32,128], index: 3, kind: input, shape index: {}]   ;;  %s415_s4 = inlined_call_operand.hbm [shape: f32[32,128], index: 4, kind: input, shape index: {}]   ;;  %s416_s5 = inlined_call_operand.hbm [shape: f32[1,128], index: 5, kind: output, shape index: {}]  }
   0x1   :  { %11 = vsyncpa [#allocation6], 0 }
   0x2   :  { %12 = vsyncpa [#allocation4], 0  ;;  %s285_s18 = smov [#allocation5]   ;;  %s286_s20 = smov [#allocation2]  }
   0x3   :  { %s34_s19 = sshll.u32 %s285_s18, 4  ;;  %s22_s21 = sshll.u32 %s286_s20, 4  ;;  %s35_s19 = int_to_ptr.vmem [resolvable:$true] %s34_s19  ;;  %s323_s21 = int_to_ptr.vmem [resolvable:$true] %s22_s21 }
   0x4   :  { %s191_s24 = scalar_lea.hbm %s414_s3, 512 }
   0x5   :  { %p192_p0 = scmp.ne.s32.totalorder %s414_s3, %s191_s24  ;;  %p195_p1 = scmp.lt.u32.totalorder %s191_s24, %s414_s3 }
   0x7   :  { %p197_p2 = pnand %p195_p1, %p192_p0 }
   0x9   :  { %200 = shalt.err (!%p197_p2)
}
   0xa   :  { %s201_s29 = scalar_lea.vmem %s35_s19, 512  ;;  %p206_p4 = scmp.lt.s32.totalorder %s35_s19, %s35_s19 }
   0xb   :  { %p202_p3 = scmp.ne.s32.totalorder %s35_s19, %s201_s29  ;;  %p207_p5 = scmp.lt.s32.totalorder %s201_s29, %s201_s29 }
   0xd   :  { %p208_p6 = por %p207_p5, %p206_p4 }
   0xf   :  { %p209_p7 = pnand %p208_p6, %p202_p3 }
  0x11   :  { %212 = shalt.err (!%p209_p7)
}
  0x12   :  { %s287_s30 = smov 128   ;;  %s288_s6 = smov 8  }
  0x13   :  { %40 = dma.hbm_to_vmem [thread:$0]  %s414_s3, 512, %s35_s19, [#allocation6], %s287_s30, %s287_s30, %s288_s6  }
  0x14   :  { %s213_s11 = scalar_lea.hbm %s413_s2, 512 }
  0x15   :  { %p214_p8 = scmp.ne.s32.totalorder %s413_s2, %s213_s11  ;;  %p217_p9 = scmp.lt.u32.totalorder %s213_s11, %s413_s2 }
  0x17   :  { %p219_p10 = pnand %p217_p9, %p214_p8 }
  0x19   :  { %222 = shalt.err (!%p219_p10)
}
  0x1a   :  { %s223_s16 = scalar_lea.vmem %s323_s21, 512  ;;  %p228_p12 = scmp.lt.s32.totalorder %s323_s21, %s323_s21 }
  0x1b   :  { %p224_p11 = scmp.ne.s32.totalorder %s323_s21, %s223_s16  ;;  %p229_p13 = scmp.lt.s32.totalorder %s223_s16, %s223_s16 }
  0x1d   :  { %p230_p0 = por %p229_p13, %p228_p12 }
  0x1f   :  { %p231_p1 = pnand %p230_p0, %p224_p11 }
  0x21   :  { %234 = shalt.err (!%p231_p1)
}
  0x22   :  { %28 = dma.hbm_to_vmem [thread:$0]  %s413_s2, 512, %s323_s21, [#allocation3], %s287_s30, %s287_s30, %s288_s6  }
  0x23   :  { %s289_s18 = smov [#allocation7]   ;;  %s235_s23 = scalar_lea.hbm %s415_s4, 512 }
  0x24   :  { %s46_s19 = sshll.u32 %s289_s18, 4  ;;  %p236_p2 = scmp.ne.s32.totalorder %s415_s4, %s235_s23  ;;  %s47_s19 = int_to_ptr.vmem [resolvable:$true] %s46_s19 }
  0x25   :  { %p239_p3 = scmp.lt.u32.totalorder %s235_s23, %s415_s4 }
  0x27   :  { %p241_p4 = pnand %p239_p3, %p236_p2 }
  0x29   :  { %244 = shalt.err (!%p241_p4)
}
  0x2a   :  { %s245_s28 = scalar_lea.vmem %s47_s19, 512  ;;  %p250_p6 = scmp.lt.s32.totalorder %s47_s19, %s47_s19 }
  0x2b   :  { %p246_p5 = scmp.ne.s32.totalorder %s47_s19, %s245_s28  ;;  %p251_p7 = scmp.lt.s32.totalorder %s245_s28, %s245_s28 }
  0x2d   :  { %p252_p8 = por %p251_p7, %p250_p6 }
  0x2f   :  { %p253_p9 = pnand %p252_p8, %p246_p5 }
  0x31   :  { %256 = shalt.err (!%p253_p9)
}
  0x32   :  { %52 = dma.hbm_to_vmem [thread:$0]  %s415_s4, 512, %s47_s19, [#allocation6], %s287_s30, %s287_s30, %s288_s6  }
  0x33   :  { %279 = dma.done.wait [#allocation3], 512  }
  0x34   :  { %280 = vsyncadd [#allocation3], 4294966784 }
  0x35   :  { %281 = dma.done.wait [#allocation6], 1024  }
  0x36   :  { %282 = vsyncadd [#allocation6], 4294966272  ;;  %v290_v0 = vmov 1   ;;  %v291_v1 = vmov 0   ;;  %v62_v2 = vld [vmem:[%s411_s0] sm:$0xff]  ;;  %v63_v3 = vld [vmem:[%s411_s0 + $0x8] sm:$0xff] }
  0x37   :  { %189 = vset.pattern.permute.xlu1 %v290_v0  ;;  %188 = vset.pattern.permute.xlu0 %v291_v1  ;;  %v64_v4 = vld [vmem:[%s411_s0 + $0x10] sm:$0xff]  ;;  %v65_v5 = vld [vmem:[%s411_s0 + $0x18] sm:$0xff]  ;;  %v67_v6 = vld [vmem:[%s412_s1 + $0x8] sm:$0xff] }
  0x38   :  { %131 = vperm.xlu1 %189, %v62_v2   ;;  %96 = vperm.xlu0 %188, %v62_v2   ;;  %v71_v7 = vld [vmem:[#allocation2 + $0x8] sm:$0xff]  ;;  %v66_v10 = vld [vmem:[%s412_s1] sm:$0xff]  ;;  %v68_v14 = vld [vmem:[%s412_s1 + $0x10] sm:$0xff] }
  0x39   :  { %v75_v8 = vld [vmem:[#allocation5 + $0x8] sm:$0xff]  ;;  %v70_v11 = vld [vmem:[#allocation2] sm:$0xff]  ;;  %v72_v19 = vld [vmem:[#allocation2 + $0x10] sm:$0xff] }
  0x3a   :  { %v79_v9 = vld [vmem:[#allocation7 + $0x8] sm:$0xff]  ;;  %v74_v12 = vld [vmem:[#allocation5] sm:$0xff]  ;;  %v123_v16 = vmul.f32 %v75_v8, %v71_v7  ;;  %v83_v17 = vmul.f32 %v75_v8, %v67_v6  ;;  %v76_v20 = vld [vmem:[#allocation5 + $0x10] sm:$0xff] }
  0x3b   :  { %v78_v13 = vld [vmem:[#allocation7] sm:$0xff]  ;;  %v119_v15 = vmul.f32 %v79_v9, %v67_v6  ;;  %v87_v18 = vmul.f32 %v79_v9, %v71_v7  ;;  %v80_v21 = vld [vmem:[#allocation7 + $0x10] sm:$0xff]  ;;  %v122_v23 = vmul.f32 %v74_v12, %v70_v11  ;;  %v82_v24 = vmul.f32 %v74_v12, %v66_v10  ;;  %v69_v32 = vld [vmem:[%s412_s1 + $0x18] sm:$0xff]  ;;  %s292_s1 = smov [#allocation8]  }
  0x3c   :  { %135 = vperm.xlu1 %189, %v63_v3   ;;  %101 = vperm.xlu0 %188, %v63_v3   ;;  %v118_v22 = vmul.f32 %v78_v13, %v66_v10  ;;  %v86_v25 = vmul.f32 %v78_v13, %v70_v11  ;;  %v120_v28 = vmul.f32 %v80_v21, %v68_v14  ;;  %v73_v35 = vld [vmem:[#allocation2 + $0x18] sm:$0xff]  ;;  %s170_s17 = sshll.u32 %s292_s1, 4  ;;  %s171_s17 = int_to_ptr.vmem [resolvable:$true] %s170_s17 }
  0x3d   :  { %v124_v29 = vmul.f32 %v76_v20, %v72_v19  ;;  %v84_v30 = vmul.f32 %v76_v20, %v68_v14  ;;  %v88_v31 = vmul.f32 %v80_v21, %v72_v19  ;;  %v127_v33 = vsub.f32 %v119_v15, %v123_v16  ;;  %v77_v36 = vld [vmem:[#allocation5 + $0x18] sm:$0xff]  ;;  %s257_s18 = scalar_lea.vmem %s171_s17, 16  ;;  %s261_s19 = scalar_lea.vmem %s171_s17, 32 }
  0x3e   :  { %v91_v34 = vadd.f32 %v87_v18, %v83_v17  ;;  %v81_v37 = vld [vmem:[#allocation7 + $0x18] sm:$0xff]  ;;  %v126_v38 = vsub.f32 %v118_v22, %v122_v23  ;;  %v90_v39 = vadd.f32 %v86_v25, %v82_v24  ;;  %v125_v45 = vmul.f32 %v77_v36, %v73_v35  ;;  %p258_p10 = scmp.ne.s32.totalorder %s171_s17, %s257_s18  ;;  %p262_p11 = scmp.lt.s32.totalorder %s171_s17, %s171_s17 }
  0x3f   :  { %v128_v42 = vsub.f32 %v120_v28, %v124_v29  ;;  %v92_v43 = vadd.f32 %v88_v31, %v84_v30  ;;  %v121_v44 = vmul.f32 %v81_v37, %v69_v32  ;;  %v85_v48 = vmul.f32 %v77_v36, %v69_v32  ;;  %p263_p12 = scmp.lt.s32.totalorder %s261_s19, %s257_s18 }
  0x40   :  { %139 = vperm.xlu1 %189, %v64_v4   ;;  %106 = vperm.xlu0 %188, %v64_v4   ;;  %v89_v49 = vmul.f32 %v81_v37, %v73_v35 }
  0x41   :  { %v129_v54 = vsub.f32 %v121_v44, %v125_v45  ;;  %p264_p13 = por %p263_p12, %p262_p11 }
  0x42   :  { %v93_v58 = vadd.f32 %v89_v49, %v85_v48 }
  0x43   :  { %p265_p0 = pnand %p264_p13, %p258_p10 }
  0x44   :  { %143 = vperm.xlu1 %189, %v65_v5   ;;  %111 = vperm.xlu0 %188, %v65_v5  }
  0x48   :  { %190 = vset.pattern.permute.xlu0 %v290_v0 }
  0xb7   :  { %v132_v26 = vpop.permute.xlu1 %131  ;;  %v97_v27 = vpop.permute.xlu0 %96 }
  0xb8   :  { %v146_v50 = vmul.f32 %v132_v26, %v126_v38  ;;  %v114_v51 = vmul.f32 %v97_v27, %v90_v39 }
  0xba   :  { %v150_v59 = vadd.f32 %v146_v50, %v114_v51 }
  0xbb   :  { %v136_v40 = vpop.permute.xlu1 %135  ;;  %v102_v41 = vpop.permute.xlu0 %101 }
  0xbc   :  { %v147_v46 = vmul.f32 %v136_v40, %v127_v33  ;;  %v115_v47 = vmul.f32 %v102_v41, %v91_v34 }
  0xbe   :  { %v151_v55 = vadd.f32 %v147_v46, %v115_v47 }
  0xbf   :  { %v140_v52 = vpop.permute.xlu1 %139  ;;  %v107_v53 = vpop.permute.xlu0 %106 }
  0xc0   :  { %v148_v56 = vmul.f32 %v140_v52, %v128_v42  ;;  %v116_v57 = vmul.f32 %v107_v53, %v92_v43  ;;  %v154_v63 = vadd.f32 %v151_v55, %v150_v59 }
  0xc2   :  { %v152_v60 = vadd.f32 %v148_v56, %v116_v57 }
  0xc3   :  { %v144_v61 = vpop.permute.xlu1 %143  ;;  %v112_v62 = vpop.permute.xlu0 %111 }
  0xc4   :  { %v149_v0 = vmul.f32 %v144_v61, %v129_v54  ;;  %v117_v1 = vmul.f32 %v112_v62, %v93_v58  ;;  %v155_v2 = vadd.f32 %v154_v63, %v152_v60 }
  0xc6   :  { %v153_v3 = vadd.f32 %v149_v0, %v117_v1 }
  0xc8   :  { %v156_v4 = vadd.f32 %v155_v2, %v153_v3 }
  0xca   :  { %v157_v5 = vrot.slane %v156_v4, 4 }
  0xcc   :  { %v158_v6 = vadd.f32 %v157_v5, %v156_v4 }
  0xce   :  { %v159_v7 = vrot.slane %v158_v6, 2 }
  0xd0   :  { %v160_v8 = vadd.f32 %v159_v7, %v158_v6 }
  0xd2   :  { %v161_v9 = vrot.slane %v160_v8, 1 }
  0xd4   :  { %v162_v10 = vadd.f32 %v161_v9, %v160_v8 }
  0xd6   :  { %163 = vst [vmem:[#allocation8] sm:$0x1] %v162_v10 }
  0xd7   :  { %268 = shalt.err (!%p265_p0)
}
  0xd8   :  { %s269_s23 = scalar_lea.hbm %s416_s5, 16 }
  0xd9   :  { %p270_p1 = scmp.ne.s32.totalorder %s416_s5, %s269_s23  ;;  %p273_p2 = scmp.lt.u32.totalorder %s269_s23, %s416_s5 }
  0xdb   :  { %p275_p3 = pnand %p273_p2, %p270_p1 }
  0xdd   :  { %278 = shalt.err (!%p275_p3)
}
  0xde   :  { %173 = dma.vmem_to_hbm [thread:$0]  %s171_s17, 16, %s416_s5, [#allocation4]  }
  0xdf   :  { %283 = dma.done.wait [#allocation4], 16  }
  0xe0   :  { %284 = vsyncadd [#allocation4], 4294967280 }
  0xe1   :  { %177 = vsyncpa [#allocation3], 1 }
  0xe2   :  { %178 = vsyncpa [#allocation6], 1 }
  0xe3   :  { %179 = vsyncpa [#allocation4], 1 }

</bundles_post_ra>
